<compile_context>
chip_gen: v5e
topology: v5e:2x2
jax: 0.10.0
libtpu: 0.0.40
codegen_flags: <defaults>
</compile_context>

<pallas_src>
import jax
import jax.numpy as jnp
from jax.experimental import pallas as pl
from jax.experimental.pallas import tpu as pltpu


def _round_up(x: int, m: int) -> int:
    return ((x + m - 1) // m) * m


def traj_pred_mlp_kernel(x_ref, w1_ref, vec_ref, w2_ref, b2_ref, o_ref):
    # ---- Linear 1: operands at native dtype on the MXU, accumulate in f32.
    h = jnp.dot(x_ref[...], w1_ref[...], preferred_element_type=jnp.float32)

    b1 = vec_ref[0:1, :].astype(jnp.float32)
    gamma = vec_ref[1:2, :].astype(jnp.float32)
    beta = vec_ref[2:3, :].astype(jnp.float32)
    h = h + b1

    # ---- LayerNorm over hidden (lane) axis in f32; eps matches torch default 1e-5.
    mean = jnp.mean(h, axis=-1, keepdims=True)
    var = jnp.mean((h - mean) ** 2, axis=-1, keepdims=True)
    h = (h - mean) * jax.lax.rsqrt(var + 1e-5)
    h = h * gamma + beta

    # ---- ReLU
    h = jnp.maximum(h, 0.0)

    # ---- Linear 2 (lane-dense padded output width)
    out = jnp.dot(h.astype(w2_ref.dtype), w2_ref[...], preferred_element_type=jnp.float32)
    out = out + b2_ref[...].astype(jnp.float32)
    o_ref[...] = out.astype(o_ref.dtype)


def traj_pred_mlp(x, w1, b1, gamma, beta, w2, b2, *, tile_b=512):
    B, in_channels = x.shape
    hidden = w1.shape[1]
    out_channels = w2.shape[1]
    elt = jnp.dtype(x.dtype).itemsize

    # Lane-dense output: pad out_channels up to a multiple of 128 with zero columns.
    out_pad = _round_up(out_channels, 128)
    w2_p = jnp.zeros((hidden, out_pad), w2.dtype).at[:, :out_channels].set(w2)
    b2_p = jnp.zeros((1, out_pad), b2.dtype).at[:, :out_channels].set(b2)

    # Pack the small per-feature vectors (b1, gamma, beta) into one array.
    vec = jnp.concatenate(
        [b1.reshape(1, hidden), gamma.reshape(1, hidden), beta.reshape(1, hidden)], axis=0
    )

    # Batch tiling: large multiple-of-8 tiles; pad B so the grid divides evenly.
    tile_b = max(8, min(tile_b, _round_up(B, 8)))
    b_pad = _round_up(B, tile_b)
    x_p = x if b_pad == B else jnp.zeros((b_pad, in_channels), x.dtype).at[:B].set(x)
    grid = (b_pad // tile_b,)

    flops = 2 * b_pad * (in_channels * hidden + hidden * out_pad) + 10 * b_pad * hidden
    bytes_accessed = (
        b_pad * (in_channels + out_pad) * elt
        + (in_channels * hidden + 3 * hidden + hidden * out_pad + out_pad) * elt
    )
    # 2x double-buffered x/out tiles + resident weights + slack for f32 intermediates.
    vmem_needed = (
        2 * tile_b * (in_channels + out_pad) * 4
        + 2 * (in_channels * hidden + 3 * hidden + hidden * out_pad + out_pad) * 4
        + 4 * tile_b * hidden
        + (4 << 20)
    )
    vmem_limit = int(min(max(vmem_needed, 16 << 20), 64 << 20))

    out_p = pl.pallas_call(
        traj_pred_mlp_kernel,
        out_shape=jax.ShapeDtypeStruct((b_pad, out_pad), x.dtype),
        grid=grid,
        in_specs=[
            pl.BlockSpec((tile_b, in_channels), lambda i: (i, 0)),  # x: tiled on batch
            pl.BlockSpec((in_channels, hidden), lambda i: (0, 0)),  # w1: VMEM-resident
            pl.BlockSpec((3, hidden), lambda i: (0, 0)),            # packed b1/gamma/beta
            pl.BlockSpec((hidden, out_pad), lambda i: (0, 0)),      # w2 (zero-padded)
            pl.BlockSpec((1, out_pad), lambda i: (0, 0)),           # b2 (zero-padded)
        ],
        out_specs=pl.BlockSpec((tile_b, out_pad), lambda i: (i, 0)),
        compiler_params=pltpu.CompilerParams(
            dimension_semantics=("parallel",),
            vmem_limit_bytes=vmem_limit,
        ),
        cost_estimate=pl.CostEstimate(
            flops=int(flops),
            transcendentals=int(b_pad),
            bytes_accessed=int(bytes_accessed),
        ),
    )(x_p, w1, vec, w2_p, b2_p)

    return out_p[:B, :out_channels]


def init_params(key, in_channels, out_channels, hidden_unit=64, dtype=jnp.float32):
    """Deterministic synthetic init mimicking PyTorch shapes:
       Linear(in, hidden), LayerNorm(hidden), Linear(hidden, out)."""
    k1, k2, k3, k4 = jax.random.split(key, 4)
    lim1 = 1.0 / jnp.sqrt(in_channels)
    lim2 = 1.0 / jnp.sqrt(hidden_unit)
    w1 = jax.random.uniform(k1, (in_channels, hidden_unit), dtype, -lim1, lim1)
    b1 = jax.random.uniform(k2, (1, hidden_unit), dtype, -lim1, lim1)
    gamma = jnp.ones((1, hidden_unit), dtype)
    beta = jnp.zeros((1, hidden_unit), dtype)
    w2 = jax.random.uniform(k3, (hidden_unit, out_channels), dtype, -lim2, lim2)
    b2 = jax.random.uniform(k4, (1, out_channels), dtype, -lim2, lim2)
    return w1, b1, gamma, beta, w2, b2


def reference_mlp(x, w1, b1, gamma, beta, w2, b2):
    h = x @ w1 + b1
    mean = jnp.mean(h, axis=-1, keepdims=True)
    var = jnp.mean((h - mean) ** 2, axis=-1, keepdims=True)
    h = (h - mean) * jax.lax.rsqrt(var + 1e-5)
    h = h * gamma + beta
    h = jnp.maximum(h, 0.0)
    return h @ w2 + b2


if __name__ == "__main__":
    # Small shapes consistent with the module: agent embedding [B, in_channels],
    # output [B, 2 * future_steps].
    B, in_channels, hidden_unit = 2, 32, 64
    future_steps = 6
    out_channels = 2 * future_steps

    key = jax.random.PRNGKey(0)
    kx, kp = jax.random.split(key)
    x = jax.random.normal(kx, (B, in_channels), jnp.float32)
    params = init_params(kp, in_channels, out_channels, hidden_unit)

    y = jax.block_until_ready(traj_pred_mlp(x, *params))
    y_ref = reference_mlp(x, *params)
    assert y.shape == (B, out_channels)
    assert jnp.allclose(y, y_ref, atol=1e-5, rtol=1e-5)

    # Exercise the multi-tile grid + ragged batch padding path.
    x2 = jax.random.normal(jax.random.PRNGKey(1), (300, in_channels), jnp.float32)
    y2 = jax.block_until_ready(traj_pred_mlp(x2, *params, tile_b=128))
    y2_ref = reference_mlp(x2, *params)
    assert y2.shape == (300, out_channels)
    assert jnp.allclose(y2, y2_ref, atol=1e-4, rtol=1e-5)

    print("KERNEL_OK")
</pallas_src>

<mosaic_0001>
module attributes {stable_mosaic.version = 11 : i64} {
  func.func @traj_pred_mlp_kernel(%arg0: i32, %arg1: memref<8x32xf32, #tpu.memory_space<vmem>>, %arg2: memref<32x64xf32, #tpu.memory_space<vmem>>, %arg3: memref<3x64xf32, #tpu.memory_space<vmem>>, %arg4: memref<64x128xf32, #tpu.memory_space<vmem>>, %arg5: memref<1x128xf32, #tpu.memory_space<vmem>>, %arg6: memref<8x128xf32, #tpu.memory_space<vmem>>) attributes {dimension_semantics = [#tpu.dimension_semantics<parallel>], iteration_bounds = array<i64: 1>, scalar_prefetch = 0 : i64, scratch_operands = 0 : i64, tpu.core_type = #tpu.core_type<tc>, window_params = [{transform_indices = @transform_0, window_bounds = array<i64: 8, 32>}, {pipeline_mode = #tpu.pipeline_mode<synchronous>, transform_indices = @transform_1, window_bounds = array<i64: 32, 64>}, {pipeline_mode = #tpu.pipeline_mode<synchronous>, transform_indices = @transform_2, window_bounds = array<i64: 3, 64>}, {pipeline_mode = #tpu.pipeline_mode<synchronous>, transform_indices = @transform_3, window_bounds = array<i64: 64, 128>}, {pipeline_mode = #tpu.pipeline_mode<synchronous>, transform_indices = @transform_4, window_bounds = array<i64: 1, 128>}, {transform_indices = @transform_5, window_bounds = array<i64: 8, 128>}]} {
    %c0 = arith.constant 0 : index
    %c0_0 = arith.constant 0 : index
    %0 = vector.load %arg1[%c0, %c0_0] : memref<8x32xf32, #tpu.memory_space<vmem>>, vector<8x32xf32>
    %c0_1 = arith.constant 0 : index
    %c0_2 = arith.constant 0 : index
    %1 = vector.load %arg2[%c0_1, %c0_2] : memref<32x64xf32, #tpu.memory_space<vmem>>, vector<32x64xf32>
    %cst = arith.constant dense<0.000000e+00> : vector<8x64xf32>
    %2 = tpu.matmul %0, %1, %cst {dimension_numbers = #tpu.dot_dimension_numbers<[1], [0], [0], [1], [0, 0, 1, 1], [], []>} : vector<8x32xf32>, vector<32x64xf32>, vector<8x64xf32> -> vector<8x64xf32>
    %c0_3 = arith.constant 0 : index
    %c0_4 = arith.constant 0 : index
    %3 = vector.load %arg3[%c0_3, %c0_4] : memref<3x64xf32, #tpu.memory_space<vmem>>, vector<1x64xf32>
    %c1 = arith.constant 1 : index
    %c0_5 = arith.constant 0 : index
    %4 = vector.load %arg3[%c1, %c0_5] : memref<3x64xf32, #tpu.memory_space<vmem>>, vector<1x64xf32>
    %c2 = arith.constant 2 : index
    %c0_6 = arith.constant 0 : index
    %5 = vector.load %arg3[%c2, %c0_6] : memref<3x64xf32, #tpu.memory_space<vmem>>, vector<1x64xf32>
    %6 = vector.broadcast %3 : vector<1x64xf32> to vector<8x64xf32>
    %7 = arith.addf %2, %6 : vector<8x64xf32>
    %cst_7 = arith.constant dense<0.000000e+00> : vector<8xf32>
    %8 = vector.multi_reduction <add>, %7, %cst_7 [1] : vector<8x64xf32> to vector<8xf32>
    %9 = vector.shape_cast %8 : vector<8xf32> to vector<8x1xf32>
    %cst_8 = arith.constant 6.400000e+01 : f32
    %10 = vector.broadcast %cst_8 : f32 to vector<8x1xf32>
    %11 = arith.divf %9, %10 : vector<8x1xf32>
    %12 = vector.broadcast %11 : vector<8x1xf32> to vector<8x64xf32>
    %13 = arith.subf %7, %12 : vector<8x64xf32>
    %14 = arith.mulf %13, %13 : vector<8x64xf32>
    %cst_9 = arith.constant dense<0.000000e+00> : vector<8xf32>
    %15 = vector.multi_reduction <add>, %14, %cst_9 [1] : vector<8x64xf32> to vector<8xf32>
    %16 = vector.shape_cast %15 : vector<8xf32> to vector<8x1xf32>
    %cst_10 = arith.constant 6.400000e+01 : f32
    %17 = vector.broadcast %cst_10 : f32 to vector<8x1xf32>
    %18 = arith.divf %16, %17 : vector<8x1xf32>
    %19 = vector.broadcast %11 : vector<8x1xf32> to vector<8x64xf32>
    %20 = arith.subf %7, %19 : vector<8x64xf32>
    %cst_11 = arith.constant 9.99999974E-6 : f32
    %21 = vector.broadcast %cst_11 : f32 to vector<8x1xf32>
    %22 = arith.addf %18, %21 : vector<8x1xf32>
    %23 = math.rsqrt %22 : vector<8x1xf32>
    %24 = vector.broadcast %23 : vector<8x1xf32> to vector<8x64xf32>
    %25 = arith.mulf %20, %24 : vector<8x64xf32>
    %26 = vector.broadcast %4 : vector<1x64xf32> to vector<8x64xf32>
    %27 = arith.mulf %25, %26 : vector<8x64xf32>
    %28 = vector.broadcast %5 : vector<1x64xf32> to vector<8x64xf32>
    %29 = arith.addf %27, %28 : vector<8x64xf32>
    %cst_12 = arith.constant 0.000000e+00 : f32
    %30 = vector.broadcast %cst_12 : f32 to vector<8x64xf32>
    %31 = arith.maximumf %29, %30 : vector<8x64xf32>
    %c0_13 = arith.constant 0 : index
    %c0_14 = arith.constant 0 : index
    %32 = vector.load %arg4[%c0_13, %c0_14] : memref<64x128xf32, #tpu.memory_space<vmem>>, vector<64x128xf32>
    %cst_15 = arith.constant dense<0.000000e+00> : vector<8x128xf32>
    %33 = tpu.matmul %31, %32, %cst_15 {dimension_numbers = #tpu.dot_dimension_numbers<[1], [0], [0], [1], [0, 0, 1, 1], [], []>} : vector<8x64xf32>, vector<64x128xf32>, vector<8x128xf32> -> vector<8x128xf32>
    %c0_16 = arith.constant 0 : index
    %c0_17 = arith.constant 0 : index
    %34 = vector.load %arg5[%c0_16, %c0_17] : memref<1x128xf32, #tpu.memory_space<vmem>>, vector<1x128xf32>
    %35 = vector.broadcast %34 : vector<1x128xf32> to vector<8x128xf32>
    %36 = arith.addf %33, %35 : vector<8x128xf32>
    %c0_18 = arith.constant 0 : index
    %c0_19 = arith.constant 0 : index
    %37 = vector.load %arg6[%c0_18, %c0_19] : memref<8x128xf32, #tpu.memory_space<vmem>>, vector<8x128xf32>
    tpu.vector_store %arg6[%c0_18, %c0_19], %36 {strides = array<i32>} : memref<8x128xf32, #tpu.memory_space<vmem>>, vector<8x128xf32>,
    return
  }
  func.func @transform_0(%arg0: i32) -> (i32, i32) {
    %c0_i32 = arith.constant 0 : i32
    %c0_i32_0 = arith.constant 0 : i32
    return %arg0, %c0_i32 : i32, i32
  }
  func.func @transform_1(%arg0: i32) -> (i32, i32) {
    %c0_i32 = arith.constant 0 : i32
    %c0_i32_0 = arith.constant 0 : i32
    %c0_i32_1 = arith.constant 0 : i32
    return %c0_i32, %c0_i32_0 : i32, i32
  }
  func.func @transform_2(%arg0: i32) -> (i32, i32) {
    %c0_i32 = arith.constant 0 : i32
    %c0_i32_0 = arith.constant 0 : i32
    %c0_i32_1 = arith.constant 0 : i32
    return %c0_i32, %c0_i32_0 : i32, i32
  }
  func.func @transform_3(%arg0: i32) -> (i32, i32) {
    %c0_i32 = arith.constant 0 : i32
    %c0_i32_0 = arith.constant 0 : i32
    %c0_i32_1 = arith.constant 0 : i32
    return %c0_i32, %c0_i32_0 : i32, i32
  }
  func.func @transform_4(%arg0: i32) -> (i32, i32) {
    %c0_i32 = arith.constant 0 : i32
    %c0_i32_0 = arith.constant 0 : i32
    %c0_i32_1 = arith.constant 0 : i32
    return %c0_i32, %c0_i32_0 : i32, i32
  }
  func.func @transform_5(%arg0: i32) -> (i32, i32) {
    %c0_i32 = arith.constant 0 : i32
    %c0_i32_0 = arith.constant 0 : i32
    return %arg0, %c0_i32 : i32, i32
  }
}

</mosaic_0001>

<bundles_post_ra>
// kernel: tpu_custom_call.1
= control target key start
LH: loop header
LB: loop body
LE: loop exit
PB: predicated region body
PF: predicated region fallthrough
CT: control target
= control target key end

     0   :  { %10 = vsyncpa [#allocation3], 0  ;;  %s408_s0 = inlined_call_operand.hbm [shape: f32[8,32], index: 0, kind: input, shape index: {}]   ;;  %s409_s1 = inlined_call_operand.hbm [shape: f32[32,64], index: 1, kind: input, shape index: {}]   ;;  %s410_s2 = inlined_call_operand.hbm [shape: f32[3,64], index: 2, kind: input, shape index: {}]   ;;  %s411_s3 = inlined_call_operand.hbm [shape: f32[64,128], index: 3, kind: input, shape index: {}]   ;;  %s412_s4 = inlined_call_operand.vmem [shape: f32[1,128], index: 4, kind: input, shape index: {}]   ;;  %s413_s5 = inlined_call_operand.hbm [shape: f32[8,128], index: 5, kind: output, shape index: {}]  }
   0x1   :  { %11 = vsyncpa [#allocation6], 0 }
   0x2   :  { %12 = vsyncpa [#allocation9], 0  ;;  %s29_s20 = sshll.u32 %s409_s1, 4  ;;  %s30_s20 = int_to_ptr.hbm [resolvable:$true] %s29_s20 }
   0x3   :  { %13 = vsyncpa [#allocation4], 0  ;;  %s349_s21 = smov [#allocation5]   ;;  %s19_s25 = sshll.u32 %s408_s0, 4  ;;  %s20_s25 = int_to_ptr.hbm [resolvable:$true] %s19_s25 }
   0x4   :  { %s31_s22 = sshll.u32 %s349_s21, 4  ;;  %s350_s26 = smov 128   ;;  %s32_s22 = int_to_ptr.vmem [resolvable:$true] %s31_s22 }
   0x5   :  { %s351_s27 = smov 8   ;;  %s352_s28 = smov [#allocation2]  }
   0x6   :  { %37 = dma.hbm_to_vmem [thread:$0]  %s30_s20, 512, %s32_s22, [#allocation6], %s350_s26, %s350_s26, %s351_s27  }
   0x7   :  { %s21_s29 = sshll.u32 %s352_s28, 4  ;;  %s43_s7 = sshll.u32 %s410_s2, 4  ;;  %s22_s29 = int_to_ptr.vmem [resolvable:$true] %s21_s29  ;;  %s44_s7 = int_to_ptr.hbm [resolvable:$true] %s43_s7 }
   0x8   :  { %24 = dma.hbm_to_vmem [thread:$0]  %s20_s25, 128, %s22_s29, [#allocation3]  }
   0x9   :  { %s53_s9 = sshll.u32 %s411_s3, 4  ;;  %s353_s10 = smov [#allocation7]   ;;  %s54_s9 = int_to_ptr.hbm [resolvable:$true] %s53_s9 }
   0xa   :  { %s45_s11 = sshll.u32 %s353_s10, 4  ;;  %s354_s0 = smov [#allocation8]   ;;  %s46_s11 = int_to_ptr.vmem [resolvable:$true] %s45_s11 }
   0xb   :  { %48 = dma.hbm_to_vmem [thread:$0]  %s44_s7, 64, %s46_s11, [#allocation6]  }
   0xc   :  { %s55_s12 = sshll.u32 %s354_s0, 4  ;;  %s56_s12 = int_to_ptr.vmem [resolvable:$true] %s55_s12 }
   0xd   :  { %61 = dma.hbm_to_vmem [thread:$0]  %s54_s9, 1024, %s56_s12, [#allocation9], %s350_s26, %s350_s26, %s351_s27  }
   0xe   :  { %341 = dma.done.wait [#allocation3], 128  }
   0xf   :  { %342 = vsyncadd [#allocation3], 4294967168 }
  0x10   :  { %343 = dma.done.wait [#allocation6], 576  }
  0x11   :  { %344 = vsyncadd [#allocation6], 4294966720 }
  0x12   :  { %345 = dma.done.wait [#allocation9], 1024  }
  0x13   :  { %346 = vsyncadd [#allocation9], 4294966272  ;;  %v84_v0 = vld [vmem:[#allocation5 + $0x18] sm:$0xff]  ;;  %v83_v1 = vld [vmem:[#allocation5 + $0x10] sm:$0xff]  ;;  %vm89_vm0 = vcmask 261120   ;;  %vm113_vm1 = vcmask 523264  }
  0x14   :  { %105 = vmatpush.msra.mxu0 %v84_v0  ;;  %v82_v2 = vld [vmem:[#allocation5 + $0x8] sm:$0xff]  ;;  %v81_v3 = vld [vmem:[#allocation5] sm:$0xff]  ;;  %v80_v4 = vld [vmem:[#allocation2] sm:$0xff]  ;;  %v355_v9 = vmov 64.0   ;;  %s356_s13 = smov [#allocation10]   ;;  %s191_s17 = sshll.u32 %s413_s5, 4  ;;  %s192_s17 = int_to_ptr.hbm [resolvable:$true] %s191_s17 }
  0x15   :  { %v213_v5 = vld [vmem:[#allocation7] ss:$0 sm:$0xff]  ;;  %217 = vrcp.f32 %v355_v9  ;;  %v154_v22 = vld [vmem:[#allocation8 + $0x30] sm:$0xff]  ;;  %v153_v23 = vld [vmem:[#allocation8 + $0x28] sm:$0xff]  ;;  %s189_s14 = sshll.u32 %s356_s13, 4  ;;  %s190_s14 = int_to_ptr.vmem [resolvable:$true] %s189_s14 }
  0x16   :  { %106 = vmatpush.msra.mxu0 %v83_v1  ;;  %v155_v21 = vld [vmem:[#allocation8 + $0x38] sm:$0xff]  ;;  %v152_v24 = vld [vmem:[#allocation8 + $0x20] sm:$0xff]  ;;  %v150_v26 = vld [vmem:[#allocation8 + $0x10] sm:$0xff] }
  0x17   :  { %171 = vmatpush.msra.mxu1 %v155_v21  ;;  %v151_v25 = vld [vmem:[#allocation8 + $0x18] sm:$0xff]  ;;  %v149_v27 = vld [vmem:[#allocation8 + $0x8] sm:$0xff]  ;;  %v148_v28 = vld [vmem:[#allocation8] sm:$0xff] }
  0x18   :  { %107 = vmatpush.msra.mxu0 %v82_v2  ;;  %v214_v38 = vld [vmem:[#allocation7 + $0x1] ss:$0 sm:$0xff]  ;;  %v215_v41 = vld [vmem:[#allocation7 + $0x2] ss:$0 sm:$0xff]  ;;  %v216_v45 = vld [vmem:[%s412_s4] ss:$0 sm:$0xff] }
  0x19   :  { %172 = vmatpush.msra.mxu1 %v154_v22 }
  0x1a   :  { %108 = vmatpush.msra.mxu0 %v81_v3 }
  0x1b   :  { %203 = vmatmul.msk.f32.vlgmr.msra.gmra.mxu0 %vm89_vm0, %v80_v4  ;;  %v218_v10 = vpop.eup %217  ;;  %173 = vmatpush.msra.mxu1 %v153_v23 }
  0x1c   :  { %v118_v11 = vmul.f32 64.0, %v218_v10  ;;  %vm122_vm2 = vweird.f32 %v218_v10 }
  0x1d   :  { %174 = vmatpush.msra.mxu1 %v152_v24 }
  0x1e   :  { %v119_v12 = vsub.f32 1.0, %v118_v11 }
  0x1f   :  { %175 = vmatpush.msra.mxu1 %v151_v25 }
  0x20   :  { %v120_v13 = vmul.f32 %v218_v10, %v119_v12 }
  0x21   :  { %176 = vmatpush.msra.mxu1 %v150_v26 }
  0x22   :  { %v121_v14 = vadd.f32 %v218_v10, %v120_v13 }
  0x23   :  { %177 = vmatpush.msra.mxu1 %v149_v27 }
  0x24   :  { %v123_v15 = vsel %vm122_vm2, %v218_v10, %v121_v14 }
  0x25   :  { %178 = vmatpush.msra.mxu1 %v148_v28 }
  0x98   :  { %v110_v6 = vpop.f32.mrf.mxu0 }
  0x99   :  { %v111_v7 = vadd.f32 %v213_v5, %v110_v6 }
  0x9b   :  { %v114_v8 = vsel %vm113_vm1, %v111_v7, 0.0 }
  0x9c   :  { %115 = vadd.xlane.f32.xlu0 %v114_v8 }
 0x10f   :  { %v116_v16 = vpop.xlane.xlu0 %115 }
 0x110   :  { %v124_v17 = vmul.f32 %v123_v15, %v116_v16 }
 0x112   :  { %v125_v18 = vsub.f32 %v111_v7, %v124_v17 }
 0x114   :  { %v126_v19 = vmul.f32 %v125_v18, %v125_v18 }
 0x116   :  { %v127_v20 = vsel %vm113_vm1, %v126_v19, 0.0 }
 0x117   :  { %128 = vadd.xlane.f32.xlu0 %v127_v20 }
 0x18a   :  { %v129_v29 = vpop.xlane.xlu0 %128 }
 0x18b   :  { %v130_v30 = vmul.f32 %v129_v29, %v123_v15 }
 0x18d   :  { %v131_v31 = vadd.f32 1e-05, %v130_v30 }
 0x18f   :  { %219 = vrsqrt.f32 %v131_v31  ;;  %vm138_vm4 = vweird.f32 %v131_v31 }
 0x195   :  { %v220_v32 = vpop.eup %219 }
 0x196   :  { %v133_v33 = vmul.f32 %v220_v32, %v131_v31  ;;  %vm139_vm3 = vweird.f32 %v220_v32 }
 0x197   :  { %vm140_vm5 = vmor %vm138_vm4, %vm139_vm3 }
 0x198   :  { %v134_v34 = vmul.f32 %v220_v32, %v133_v33 }
 0x19a   :  { %v135_v35 = vmul.f32 0.5, %v134_v34 }
 0x19c   :  { %v136_v36 = vsub.f32 1.5, %v135_v35 }
 0x19e   :  { %v137_v37 = vmul.f32 %v220_v32, %v136_v36 }
 0x1a0   :  { %v141_v39 = vsel %vm140_vm5, %v220_v32, %v137_v37 }
 0x1a1   :  { %v142_v40 = vmul.f32 %v141_v39, %v125_v18 }
 0x1a3   :  { %v144_v42 = vmul.f32 %v214_v38, %v142_v40 }
 0x1a5   :  { %v146_v43 = vadd.f32 %v215_v41, %v144_v42 }
 0x1a7   :  { %v147_v44 = vmax.f32 %v146_v43, 0.0 }
 0x1a9   :  { %204 = vmatmul.msk.f32.vlgmr.msra.gmra.mxu1 %vm113_vm1, %v147_v44 }
 0x226   :  { %v180_v46 = vpop.f32.mrf.mxu1 }
 0x227   :  { %v181_v47 = vadd.f32 %v216_v45, %v180_v46 }
 0x229   :  { %183 = vst [vmem:[#allocation10] sm:$0xff] %v181_v47 }
 0x22a   :  { %194 = dma.vmem_to_hbm [thread:$0]  %s190_s14, 128, %s192_s17, [#allocation4]  }
 0x22b   :  { %347 = dma.done.wait [#allocation4], 128  }
 0x22c   :  { %348 = vsyncadd [#allocation4], 4294967168 }
 0x22d   :  { %199 = vsyncpa [#allocation3], 1 }
 0x22e   :  { %200 = vsyncpa [#allocation6], 1 }
 0x22f   :  { %201 = vsyncpa [#allocation9], 1 }
 0x230   :  { %202 = vsyncpa [#allocation4], 1 }

</bundles_post_ra>
